<compile_context>
chip_gen: v7x
topology: tpu7x:2x2x1
jax: 0.10.0
libtpu: 0.0.40
codegen_flags: <defaults>
</compile_context>

<pallas_src>
import functools

import jax
import jax.numpy as jnp
from jax.experimental import pallas as pl
from jax.experimental.pallas import tpu as pltpu

LANE = 128
_FUSED_VMEM_BUDGET = 4 * 1024 * 1024   # resident bytes allowed on the fused path
_FUSED_MAX_BATCH = 32                  # bound on the static batch unroll
_TILE_VMEM_BUDGET = 8 * 1024 * 1024    # double-buffered working-set budget (tiled path)


def _round_up(v, m):
    return -(-v // m) * m


# --------------------------------------------------------------------------
# Fused path: whole problem resident in VMEM, single kernel launch.
# --------------------------------------------------------------------------
def _fused_kernel(x_ref, w_ref, g_ref, b_ref, o_ref, y_scr, *, count, eps, use_relu):
    n = x_ref.shape[0]
    c_out = w_ref.shape[0]
    w = w_ref[...]

    s = jnp.zeros((c_out, 1), jnp.float32)
    ss = jnp.zeros((c_out, 1), jnp.float32)
    for i in range(n):                       # n is small on this path
        xv = x_ref[i]
        if xv.dtype != jnp.float32:
            xv = xv.astype(jnp.float32)
        y = jnp.dot(w, xv, preferred_element_type=jnp.float32)
        y_scr[i] = y                         # cache conv result, no recompute
        s = s + jnp.sum(y, axis=1, keepdims=True)
        ss = ss + jnp.sum(y * y, axis=1, keepdims=True)

    inv_n = 1.0 / count
    mean = s * inv_n
    var = jnp.maximum(ss * inv_n - mean * mean, 0.0)   # clamp vs cancellation
    scale = g_ref[...] * jax.lax.rsqrt(var + eps)
    shift = b_ref[...] - mean * scale

    for i in range(n):
        out = y_scr[i] * scale + shift
        if use_relu:
            out = jnp.maximum(out, 0.0)
        o_ref[i] = out.astype(o_ref.dtype)


# --------------------------------------------------------------------------
# Tiled two-pass path (large N*L).
# --------------------------------------------------------------------------
def _stats_kernel(x_ref, w_ref, sum_ref, sq_ref, *, l_valid):
    """Per-(batch, length-tile) partial sum / sum-of-squares of y = W @ x."""
    xv = x_ref[...]
    if xv.dtype != jnp.float32:
        xv = xv.astype(jnp.float32)
    y = jnp.dot(w_ref[...], xv, preferred_element_type=jnp.float32)

    l_tile = x_ref.shape[-1]
    if l_valid % l_tile != 0:
        # Ragged tail: mask out-of-range columns (jnp.where is NaN-safe even
        # if the over-read block region holds garbage).
        col = jax.lax.broadcasted_iota(jnp.int32, y.shape, 1)
        col = col + pl.program_id(1) * l_tile
        y = jnp.where(col < l_valid, y, 0.0)

    sum_ref[...] = jnp.sum(y, axis=1, keepdims=True)
    sq_ref[...] = jnp.sum(y * y, axis=1, keepdims=True)


def _apply_kernel(x_ref, w_ref, shift_ref, o_ref, *, use_relu):
    """BN scale is pre-folded into w, so this is matmul + add (+ relu)."""
    xv = x_ref[...]
    if xv.dtype != jnp.float32:
        xv = xv.astype(jnp.float32)
    y = jnp.dot(w_ref[...], xv, preferred_element_type=jnp.float32)
    out = y + shift_ref[...]
    if use_relu:
        out = jnp.maximum(out, 0.0)
    o_ref[...] = out.astype(o_ref.dtype)


# --------------------------------------------------------------------------
# Wrapper
# --------------------------------------------------------------------------
def conv_norm_activation(x, weight, gamma, beta, *, eps=1e-5, use_relu=True,
                         out_dtype=None, fuse=None):
    """x: (N, C_in, L); weight: (C_out, C_in, 1) (PyTorch Conv1d layout);
    gamma, beta: (C_out,).  Returns (N, C_out, L) in `out_dtype` (default x.dtype)."""
    n, c_in, l = x.shape
    c_out = weight.shape[0]
    out_dtype = x.dtype if out_dtype is None else out_dtype

    w2d = weight.reshape(c_out, c_in).astype(jnp.float32)
    g2d = gamma.reshape(c_out, 1).astype(jnp.float32)
    b2d = beta.reshape(c_out, 1).astype(jnp.float32)
    count = float(n * l)

    # ---- Fused single-launch path: x + conv-result + output resident in VMEM.
    resident_bytes = n * l * 4 * (c_in + 2 * c_out)
    if fuse is None:
        fuse = (resident_bytes <= _FUSED_VMEM_BUDGET) and (n <= _FUSED_MAX_BATCH)
    if fuse:
        return pl.pallas_call(
            functools.partial(_fused_kernel, count=count, eps=eps, use_relu=use_relu),
            out_shape=jax.ShapeDtypeStruct((n, c_out, l), out_dtype),
            scratch_shapes=[pltpu.VMEM((n, c_out, l), jnp.float32)],
        )(x, w2d, g2d, b2d)

    # ---- Tiled two-pass path.
    # Tile chosen from a VMEM budget FIRST (f32, double-buffered x-in + out),
    # as a multiple of 128 lanes; no host-side padding of x.
    bytes_per_lane = 4 * 2 * (c_in + c_out)
    max_tile = max(LANE, (_TILE_VMEM_BUDGET // bytes_per_lane) // LANE * LANE)
    l_tile = min(max_tile, _round_up(l, LANE))
    grid_l = pl.cdiv(l, l_tile)
    grid = (n, grid_l)

    x_spec = pl.BlockSpec((None, c_in, l_tile), lambda i, j: (i, 0, j))
    w_spec = pl.BlockSpec((c_out, c_in), lambda i, j: (0, 0))
    vec_spec = pl.BlockSpec((c_out, 1), lambda i, j: (0, 0))
    part_spec = pl.BlockSpec((None, None, c_out, 1), lambda i, j: (i, j, 0, 0))
    part_shape = jax.ShapeDtypeStruct((n, grid_l, c_out, 1), jnp.float32)

    # Phase 1: per-tile partial moments, fully parallel grid (megacore friendly).
    sums, sqs = pl.pallas_call(
        functools.partial(_stats_kernel, l_valid=l),
        out_shape=(part_shape, part_shape),
        grid=grid,
        in_specs=[x_spec, w_spec],
        out_specs=(part_spec, part_spec),
        compiler_params=pltpu.CompilerParams(
            dimension_semantics=("parallel", "parallel")),
    )(x, w2d)

    # Tiny (c_out,) finalize in plain JAX: moments -> fused scale/shift,
    # then fold the scale into the conv weights for the apply pass.
    s = jnp.sum(sums, axis=(0, 1))           # (c_out, 1)
    ss = jnp.sum(sqs, axis=(0, 1))           # (c_out, 1)
    mean = s / count
    var = jnp.maximum(ss / count - mean * mean, 0.0)
    scale = g2d * jax.lax.rsqrt(var + eps)
    shift = b2d - mean * scale
    w_scaled = w2d * scale

    # Phase 2: conv with folded scale + shift + activation, lane-dense output.
    out = pl.pallas_call(
        functools.partial(_apply_kernel, use_relu=use_relu),
        out_shape=jax.ShapeDtypeStruct((n, c_out, l), out_dtype),
        grid=grid,
        in_specs=[x_spec, w_spec, vec_spec],
        out_specs=pl.BlockSpec((None, c_out, l_tile), lambda i, j: (i, 0, j)),
        compiler_params=pltpu.CompilerParams(
            dimension_semantics=("parallel", "parallel")),
    )(x, w_scaled, shift)
    return out


# --------------------------------------------------------------------------
# Reference + tests
# --------------------------------------------------------------------------
def reference(x, weight, gamma, beta, *, eps=1e-5, use_relu=True):
    """Pure-JAX replica of the PyTorch forward (Conv1d k=1 -> BN1d train -> act)."""
    w2d = weight.reshape(weight.shape[0], -1)
    y = jnp.einsum("oc,ncl->nol", w2d.astype(jnp.float32), x.astype(jnp.float32))
    mean = jnp.mean(y, axis=(0, 2), keepdims=True)
    var = jnp.mean((y - mean) ** 2, axis=(0, 2), keepdims=True)
    y = (y - mean) / jnp.sqrt(var + eps)
    y = gamma.reshape(1, -1, 1) * y + beta.reshape(1, -1, 1)
    if use_relu:
        y = jnp.maximum(y, 0.0)
    return y


def _run_case(key, n, c_in, c_out, l, use_relu, fuse=None):
    kx, kw, kg, kb = jax.random.split(key, 4)
    x = jax.random.normal(kx, (n, c_in, l), dtype=jnp.float32)
    weight = jax.random.normal(kw, (c_out, c_in, 1), dtype=jnp.float32) * 0.5
    gamma = 1.0 + 0.1 * jax.random.normal(kg, (c_out,), dtype=jnp.float32)
    beta = 0.1 * jax.random.normal(kb, (c_out,), dtype=jnp.float32)

    out = jax.block_until_ready(
        conv_norm_activation(x, weight, gamma, beta, use_relu=use_relu, fuse=fuse))
    ref = reference(x, weight, gamma, beta, use_relu=use_relu)

    assert out.shape == (n, c_out, l), out.shape
    if not jnp.allclose(out.astype(jnp.float32), ref, atol=1e-3, rtol=1e-3):
        err = float(jnp.max(jnp.abs(out.astype(jnp.float32) - ref)))
        raise AssertionError(f"Pallas kernel does not match reference (max err {err})")


if __name__ == "__main__":
    key = jax.random.PRNGKey(0)
    k1, k2, k3, k4 = jax.random.split(key, 4)

    # ConvNormActivation(4, 8, activation_layer=nn.ReLU) on (N, C_in, L) = (2, 4, 16).
    # Small problem -> fused single-launch path.
    _run_case(k1, n=2, c_in=4, c_out=8, l=16, use_relu=True)

    # Projection-style block (activation_layer=None), fused path, non-128 length.
    _run_case(k2, n=3, c_in=8, c_out=16, l=200, use_relu=False)

    # Force the tiled two-pass path at a small shape: exercises the ragged-tail
    # mask (L=200 -> 256-lane tile) and the JAX-side scale/shift fold.
    _run_case(k3, n=2, c_in=4, c_out=8, l=200, use_relu=True, fuse=False)

    # Two-pass path with an exactly-divisible length (no masking branch).
    _run_case(k4, n=2, c_in=8, c_out=16, l=256, use_relu=False, fuse=False)

    print("KERNEL_OK")
</pallas_src>

<mosaic_0001>
module attributes {stable_mosaic.version = 11 : i64} {
  func.func @_fused_kernel(%arg0: memref<2x4x16xf32, #tpu.memory_space<vmem>>, %arg1: memref<8x4xf32, #tpu.memory_space<vmem>>, %arg2: memref<8x1xf32, #tpu.memory_space<vmem>>, %arg3: memref<8x1xf32, #tpu.memory_space<vmem>>, %arg4: memref<2x8x16xf32, #tpu.memory_space<vmem>>, %arg5: memref<2x8x16xf32, #tpu.memory_space<vmem>>) attributes {dimension_semantics = [], scalar_prefetch = 0 : i64, scratch_operands = 1 : i64, tpu.core_type = #tpu.core_type<tc>} {
    %c0 = arith.constant 0 : index
    %c0_0 = arith.constant 0 : index
    %0 = vector.load %arg1[%c0, %c0_0] : memref<8x4xf32, #tpu.memory_space<vmem>>, vector<8x4xf32>
    %cst = arith.constant 0.000000e+00 : f32
    %1 = vector.broadcast %cst : f32 to vector<8x1xf32>
    %cst_1 = arith.constant 0.000000e+00 : f32
    %2 = vector.broadcast %cst_1 : f32 to vector<8x1xf32>
    %c0_2 = arith.constant 0 : index
    %c0_3 = arith.constant 0 : index
    %c0_4 = arith.constant 0 : index
    %3 = vector.load %arg0[%c0_2, %c0_3, %c0_4] : memref<2x4x16xf32, #tpu.memory_space<vmem>>, vector<1x4x16xf32>
    %4 = vector.shape_cast %3 : vector<1x4x16xf32> to vector<4x16xf32>
    %cst_5 = arith.constant dense<0.000000e+00> : vector<8x16xf32>
    %5 = tpu.matmul %0, %4, %cst_5 {dimension_numbers = #tpu.dot_dimension_numbers<[1], [0], [0], [1], [0, 0, 1, 1], [], []>} : vector<8x4xf32>, vector<4x16xf32>, vector<8x16xf32> -> vector<8x16xf32>
    %c0_6 = arith.constant 0 : index
    %c0_7 = arith.constant 0 : index
    %c0_8 = arith.constant 0 : index
    %6 = vector.load %arg5[%c0_6, %c0_7, %c0_8] : memref<2x8x16xf32, #tpu.memory_space<vmem>>, vector<1x8x16xf32>
    %7 = vector.shape_cast %6 : vector<1x8x16xf32> to vector<8x16xf32>
    %8 = vector.shape_cast %5 : vector<8x16xf32> to vector<1x8x16xf32>
    tpu.vector_store %arg5[%c0_6, %c0_7, %c0_8], %8 {strides = array<i32>} : memref<2x8x16xf32, #tpu.memory_space<vmem>>, vector<1x8x16xf32>,
    %cst_9 = arith.constant dense<0.000000e+00> : vector<8xf32>
    %9 = vector.multi_reduction <add>, %5, %cst_9 [1] : vector<8x16xf32> to vector<8xf32>
    %10 = vector.shape_cast %9 : vector<8xf32> to vector<8x1xf32>
    %11 = arith.addf %1, %10 : vector<8x1xf32>
    %12 = arith.mulf %5, %5 : vector<8x16xf32>
    %cst_10 = arith.constant dense<0.000000e+00> : vector<8xf32>
    %13 = vector.multi_reduction <add>, %12, %cst_10 [1] : vector<8x16xf32> to vector<8xf32>
    %14 = vector.shape_cast %13 : vector<8xf32> to vector<8x1xf32>
    %15 = arith.addf %2, %14 : vector<8x1xf32>
    %c1 = arith.constant 1 : index
    %c0_11 = arith.constant 0 : index
    %c0_12 = arith.constant 0 : index
    %16 = vector.load %arg0[%c1, %c0_11, %c0_12] : memref<2x4x16xf32, #tpu.memory_space<vmem>>, vector<1x4x16xf32>
    %17 = vector.shape_cast %16 : vector<1x4x16xf32> to vector<4x16xf32>
    %cst_13 = arith.constant dense<0.000000e+00> : vector<8x16xf32>
    %18 = tpu.matmul %0, %17, %cst_13 {dimension_numbers = #tpu.dot_dimension_numbers<[1], [0], [0], [1], [0, 0, 1, 1], [], []>} : vector<8x4xf32>, vector<4x16xf32>, vector<8x16xf32> -> vector<8x16xf32>
    %c1_14 = arith.constant 1 : index
    %c0_15 = arith.constant 0 : index
    %c0_16 = arith.constant 0 : index
    %19 = vector.load %arg5[%c1_14, %c0_15, %c0_16] : memref<2x8x16xf32, #tpu.memory_space<vmem>>, vector<1x8x16xf32>
    %20 = vector.shape_cast %19 : vector<1x8x16xf32> to vector<8x16xf32>
    %21 = vector.shape_cast %18 : vector<8x16xf32> to vector<1x8x16xf32>
    tpu.vector_store %arg5[%c1_14, %c0_15, %c0_16], %21 {strides = array<i32>} : memref<2x8x16xf32, #tpu.memory_space<vmem>>, vector<1x8x16xf32>,
    %cst_17 = arith.constant dense<0.000000e+00> : vector<8xf32>
    %22 = vector.multi_reduction <add>, %18, %cst_17 [1] : vector<8x16xf32> to vector<8xf32>
    %23 = vector.shape_cast %22 : vector<8xf32> to vector<8x1xf32>
    %24 = arith.addf %11, %23 : vector<8x1xf32>
    %25 = arith.mulf %18, %18 : vector<8x16xf32>
    %cst_18 = arith.constant dense<0.000000e+00> : vector<8xf32>
    %26 = vector.multi_reduction <add>, %25, %cst_18 [1] : vector<8x16xf32> to vector<8xf32>
    %27 = vector.shape_cast %26 : vector<8xf32> to vector<8x1xf32>
    %28 = arith.addf %15, %27 : vector<8x1xf32>
    %cst_19 = arith.constant 3.125000e-02 : f32
    %29 = vector.broadcast %cst_19 : f32 to vector<8x1xf32>
    %30 = arith.mulf %24, %29 : vector<8x1xf32>
    %cst_20 = arith.constant 3.125000e-02 : f32
    %31 = vector.broadcast %cst_20 : f32 to vector<8x1xf32>
    %32 = arith.mulf %28, %31 : vector<8x1xf32>
    %33 = arith.mulf %30, %30 : vector<8x1xf32>
    %34 = arith.subf %32, %33 : vector<8x1xf32>
    %cst_21 = arith.constant 0.000000e+00 : f32
    %35 = vector.broadcast %cst_21 : f32 to vector<8x1xf32>
    %36 = arith.maximumf %34, %35 : vector<8x1xf32>
    %c0_22 = arith.constant 0 : index
    %c0_23 = arith.constant 0 : index
    %37 = vector.load %arg2[%c0_22, %c0_23] : memref<8x1xf32, #tpu.memory_space<vmem>>, vector<8x1xf32>
    %cst_24 = arith.constant 9.99999974E-6 : f32
    %38 = vector.broadcast %cst_24 : f32 to vector<8x1xf32>
    %39 = arith.addf %36, %38 : vector<8x1xf32>
    %40 = math.rsqrt %39 : vector<8x1xf32>
    %41 = arith.mulf %37, %40 : vector<8x1xf32>
    %c0_25 = arith.constant 0 : index
    %c0_26 = arith.constant 0 : index
    %42 = vector.load %arg3[%c0_25, %c0_26] : memref<8x1xf32, #tpu.memory_space<vmem>>, vector<8x1xf32>
    %43 = arith.mulf %30, %41 : vector<8x1xf32>
    %44 = arith.subf %42, %43 : vector<8x1xf32>
    %c0_27 = arith.constant 0 : index
    %c0_28 = arith.constant 0 : index
    %c0_29 = arith.constant 0 : index
    %45 = vector.load %arg5[%c0_27, %c0_28, %c0_29] : memref<2x8x16xf32, #tpu.memory_space<vmem>>, vector<1x8x16xf32>
    %46 = vector.shape_cast %45 : vector<1x8x16xf32> to vector<8x16xf32>
    %47 = vector.broadcast %41 : vector<8x1xf32> to vector<8x16xf32>
    %48 = arith.mulf %46, %47 : vector<8x16xf32>
    %49 = vector.broadcast %44 : vector<8x1xf32> to vector<8x16xf32>
    %50 = arith.addf %48, %49 : vector<8x16xf32>
    %cst_30 = arith.constant 0.000000e+00 : f32
    %51 = vector.broadcast %cst_30 : f32 to vector<8x16xf32>
    %52 = arith.maximumf %50, %51 : vector<8x16xf32>
    %c0_31 = arith.constant 0 : index
    %c0_32 = arith.constant 0 : index
    %c0_33 = arith.constant 0 : index
    %53 = vector.load %arg4[%c0_31, %c0_32, %c0_33] : memref<2x8x16xf32, #tpu.memory_space<vmem>>, vector<1x8x16xf32>
    %54 = vector.shape_cast %53 : vector<1x8x16xf32> to vector<8x16xf32>
    %55 = vector.shape_cast %52 : vector<8x16xf32> to vector<1x8x16xf32>
    tpu.vector_store %arg4[%c0_31, %c0_32, %c0_33], %55 {strides = array<i32>} : memref<2x8x16xf32, #tpu.memory_space<vmem>>, vector<1x8x16xf32>,
    %c1_34 = arith.constant 1 : index
    %c0_35 = arith.constant 0 : index
    %c0_36 = arith.constant 0 : index
    %56 = vector.load %arg5[%c1_34, %c0_35, %c0_36] : memref<2x8x16xf32, #tpu.memory_space<vmem>>, vector<1x8x16xf32>
    %57 = vector.shape_cast %56 : vector<1x8x16xf32> to vector<8x16xf32>
    %58 = vector.broadcast %41 : vector<8x1xf32> to vector<8x16xf32>
    %59 = arith.mulf %57, %58 : vector<8x16xf32>
    %60 = vector.broadcast %44 : vector<8x1xf32> to vector<8x16xf32>
    %61 = arith.addf %59, %60 : vector<8x16xf32>
    %cst_37 = arith.constant 0.000000e+00 : f32
    %62 = vector.broadcast %cst_37 : f32 to vector<8x16xf32>
    %63 = arith.maximumf %61, %62 : vector<8x16xf32>
    %c1_38 = arith.constant 1 : index
    %c0_39 = arith.constant 0 : index
    %c0_40 = arith.constant 0 : index
    %64 = vector.load %arg4[%c1_38, %c0_39, %c0_40] : memref<2x8x16xf32, #tpu.memory_space<vmem>>, vector<1x8x16xf32>
    %65 = vector.shape_cast %64 : vector<1x8x16xf32> to vector<8x16xf32>
    %66 = vector.shape_cast %63 : vector<8x16xf32> to vector<1x8x16xf32>
    tpu.vector_store %arg4[%c1_38, %c0_39, %c0_40], %66 {strides = array<i32>} : memref<2x8x16xf32, #tpu.memory_space<vmem>>, vector<1x8x16xf32>,
    return
  }
}

</mosaic_0001>

<bundles_post_ra>
// kernel: tpu_custom_call.1
= control target key start
LH: loop header
LB: loop body
LE: loop exit
PB: predicated region body
PF: predicated region fallthrough
CT: control target
= control target key end

     0   :  { %vm24_vm0 = vcmask 1043456   ;;  %v297_v2 = vmov 0.0   ;;  %vm298_vm1 = vmmov 0   ;;  %vm20_vm2 = vcmask 31744   ;;  %s363_s0 = inlined_call_operand.vmem [shape: f32[2,4,16], index: 0, kind: input, shape index: {}]   ;;  %s364_s1 = inlined_call_operand.vmem [shape: f32[8,4], index: 1, kind: input, shape index: {}]   ;;  %s365_s2 = inlined_call_operand.vmem [shape: f32[8,1], index: 2, kind: input, shape index: {}]   ;;  %s366_s3 = inlined_call_operand.vmem [shape: f32[8,1], index: 3, kind: input, shape index: {}]   ;;  %s367_s4 = inlined_call_operand.hbm [shape: f32[2,8,16], index: 4, kind: output, shape index: {}]  }
   0x1   :  { %v19_v0 = vld [vmem:[%s363_s0] sm:$0xf]  ;;  %253 = vmatprep.subr.mxu0 %v297_v2  ;;  %255 = vmatprep.mubr.msk.f32.mxu0 %vm298_vm1, %v297_v2  ;;  %v246_v3 = vld [vmem:[%s363_s0 + $0x4] sm:$0xf] }
   0x2   :  { %v18_v1 = vld [vmem:[%s364_s1] sm:$0xff] }
   0x3   :  { %9 = vsyncpa [#allocation4], 0  ;;  %254 = vmatpush3.msk.msra.mxu0 %vm24_vm0, %v19_v0  ;;  %258 = vmatprep.subr.mxu1 %v297_v2  ;;  %vm98_vm3 = vcmask 130048   ;;  %v299_v14 = vmov 0   ;;  %v200_v27 = vld [vmem:[%s365_s2] sm:$0xff]  ;;  %s300_s23 = smov [#allocation3]  }
   0x4   :  { %256 = vmatmul.mubr.msk.f32.vlgmr.msra.gmra.mrb[0].mxu0 %vm20_vm2, %v18_v1  ;;  %259 = vmatpush3.msk.msra.mxu1 %vm24_vm0, %v246_v3  ;;  %v204_v30 = vld [vmem:[%s366_s3] sm:$0xff]  ;;  %s233_s24 = sshll.u32 %s300_s23, 4  ;;  %s234_s24 = int_to_ptr.vmem [resolvable:$true] %s233_s24 }
   0x5   :  { %260 = vmatprep.mubr.msk.f32.mxu1 %vm298_vm1, %v297_v2  ;;  %269 = vset.pattern.permute.xlu0 %v299_v14  ;;  %s273_s2 = scalar_lea.vmem %s234_s24, 256  ;;  %p278_p1 = scmp.lt.s32.totalorder %s234_s24, %s234_s24 }
   0x6   :  { %261 = vmatmul.mubr.msk.f32.vlgmr.msra.gmra.mrb[0].mxu1 %vm20_vm2, %v18_v1  ;;  %270 = vset.pattern.permute.xlu1 %v299_v14  ;;  %p274_p0 = scmp.ne.s32.totalorder %s234_s24, %s273_s2  ;;  %p279_p2 = scmp.lt.s32.totalorder %s273_s2, %s273_s2 }
   0x8   :  { %p280_p3 = por %p279_p2, %p278_p1 }
   0xa   :  { %p281_p4 = pnand %p280_p3, %p274_p0 }
  0xd7   :  { %v94_v4 = vpop.f32.mrb[0].mxu0 }
  0xd8   :  { %99 = vst.msk [vmem:[#allocation2] sm:$0xff] %vm98_vm3, %v94_v4  ;;  %v257_v5 = vpop.f32.mrb[1].mxu0  ;;  %v100_v6 = vsel %vm98_vm3, %v94_v4, 0.0  ;;  %v104_v7 = vmul.f32 %v94_v4, %v94_v4 }
  0xd9   :  { %101 = vadd.xlane.f32.xlu0 %v100_v6  ;;  %v180_v8 = vpop.f32.mrb[0].mxu1 }
  0xda   :  { %185 = vst.msk [vmem:[#allocation2 + $0x8] sm:$0xff] %vm98_vm3, %v180_v8  ;;  %v262_v9 = vpop.f32.mrb[1].mxu1  ;;  %v105_v10 = vsel %vm98_vm3, %v104_v7, 0.0  ;;  %v186_v11 = vsel %vm98_vm3, %v180_v8, 0.0  ;;  %v190_v12 = vmul.f32 %v180_v8, %v180_v8 }
  0xdb   :  { %106 = vadd.xlane.f32.xlu1 %v105_v10 }
  0xdc   :  { %v191_v13 = vsel %vm98_vm3, %v190_v12, 0.0 }
  0xdd   :  { %187 = vadd.xlane.f32.xlu0 %v186_v11 }
  0xdf   :  { %192 = vadd.xlane.f32.xlu1 %v191_v13  ;;  %v207_v35 = vld [vmem:[#allocation2] sm:$0xff] }
  0xe1   :  { %v222_v34 = vld [vmem:[#allocation2 + $0x8] sm:$0xff] }
 0x166   :  { %v102_v15 = vpop.xlane.xlu0 %101 }
 0x168   :  { %v107_v16 = vpop.xlane.xlu1 %106 }
 0x16a   :  { %v188_v17 = vpop.xlane.xlu0 %187 }
 0x16b   :  { %v189_v18 = vadd.f32 %v188_v17, %v102_v15 }
 0x16c   :  { %v193_v19 = vpop.xlane.xlu1 %192 }
 0x16d   :  { %v195_v20 = vmul.f32 0.03125, %v189_v18  ;;  %v194_v21 = vadd.f32 %v193_v19, %v107_v16 }
 0x16f   :  { %v197_v22 = vmul.f32 %v195_v20, %v195_v20  ;;  %v196_v23 = vmul.f32 0.03125, %v194_v21 }
 0x171   :  { %v198_v24 = vsub.f32 %v196_v23, %v197_v22 }
 0x173   :  { %v199_v25 = vmax.f32 %v198_v24, 0.0 }
 0x175   :  { %v201_v26 = vadd.f32 1e-05, %v199_v25 }
 0x177   :  { %271 = vrsqrt.f32 %v201_v26 }
 0x181   :  { %v272_v28 = vpop.eup %271 }
 0x182   :  { %v203_v29 = vmul.f32 %v272_v28, %v200_v27 }
 0x184   :  { %210 = vperm.xlu0 %269, %v203_v29   ;;  %v205_v31 = vmul.f32 %v203_v29, %v195_v20 }
 0x186   :  { %v206_v32 = vsub.f32 %v204_v30, %v205_v31 }
 0x188   :  { %216 = vperm.xlu1 %270, %v206_v32  }
 0x203   :  { %v211_v33 = vpop.permute.xlu0 %210 }
 0x204   :  { %v213_v36 = vmul.f32 %v211_v33, %v207_v35  ;;  %v223_v37 = vmul.f32 %v222_v34, %v211_v33 }
 0x207   :  { %v217_v38 = vpop.permute.xlu1 %216 }
 0x208   :  { %v219_v39 = vadd.f32 %v217_v38, %v213_v36  ;;  %v224_v40 = vadd.f32 %v223_v37, %v217_v38 }
 0x20a   :  { %v220_v41 = vmax.f32 %v219_v39, 0.0  ;;  %v225_v42 = vmax.f32 %v224_v40, 0.0 }
 0x20c   :  { %221 = vst.msk [vmem:[#allocation3] sm:$0xff] %vm98_vm3, %v220_v41  ;;  %227 = vst.msk [vmem:[#allocation3 + $0x8] sm:$0xff] %vm98_vm3, %v225_v42 }
 0x20d   :  { %284 = shalt.err (!%p281_p4)
}
 0x20e   :  { %s285_s26 = scalar_lea.hbm %s367_s4, 256 }
 0x20f   :  { %p286_p5 = scmp.ne.s32.totalorder %s367_s4, %s285_s26  ;;  %p289_p6 = scmp.lt.u32.totalorder %s285_s26, %s367_s4 }
 0x211   :  { %p291_p7 = pnand %p289_p6, %p286_p5 }
 0x213   :  { %294 = shalt.err (!%p291_p7)
}
 0x214   :  { %s301_s5 = smov 128   ;;  %s302_s6 = smov 8  }
 0x215   :  { %239 = dma.vmem_to_hbm [thread:$0]  %s234_s24, 256, %s367_s4, [#allocation4], %s301_s5, %s301_s5, %s302_s6  }
 0x216   :  { %295 = dma.done.wait [#allocation4], 256  }
 0x217   :  { %296 = vsyncadd [#allocation4], 4294967040 }
 0x218   :  { %243 = vsyncpa [#allocation4], 1 }

</bundles_post_ra>
